<compile_context>
chip_gen: v6e
topology: v6e:2x2x1
jax: 0.10.0
libtpu: 0.0.40
codegen_flags: <defaults>
</compile_context>

<pallas_src>
import functools

import jax
import jax.numpy as jnp
from jax.experimental import pallas as pl
from jax.experimental.pallas import tpu as pltpu

_LANES = 128
_DEFAULT_TILE_ROWS = 4096   # 512K samples/step; fits every generation's VMEM.


def _focal_loss_kernel(logits_ref, targets_ref, out_ref, acc_ref, *,
                       alpha, gamma, n_valid, tile_rows, inv_n, reduction):
    # logits_ref : (C, tile_rows, 128)  input dtype, VMEM
    # targets_ref: (tile_rows, 128)     int,         VMEM
    # out_ref    : (1, 1) f32,          SMEM (written once, last step)
    # acc_ref    : (8, 128) f32,        VMEM (per-lane partial-sum accumulator)
    i = pl.program_id(0)

    @pl.when(i == 0)
    def _():
        acc_ref[...] = jnp.zeros_like(acc_ref)

    t = targets_ref[...].astype(jnp.int32)                    # (R, 128)
    c = logits_ref.shape[0]
    r, lanes = t.shape

    # Global sample index of each (row, lane) element; mask padded and
    # ragged-OOB lanes.  Sanitizing x via where() keeps the exp/log chain free
    # of garbage inf/NaN from the unspecified OOB region of the last block.
    row_idx = jax.lax.broadcasted_iota(jnp.int32, (r, lanes), 0)
    lane_idx = jax.lax.broadcasted_iota(jnp.int32, (r, lanes), 1)
    sample = (i * tile_rows + row_idx) * lanes + lane_idx
    valid = sample < n_valid

    xs = [jnp.where(valid, logits_ref[k].astype(jnp.float32), 0.0)
          for k in range(c)]                                   # C dense slabs

    # Numerically-stable cross-entropy, statically unrolled over classes:
    # pure VPU maximum/add/select + EUP exp/log, no cross-sublane reductions.
    m = xs[0]
    for k in range(1, c):
        m = jnp.maximum(m, xs[k])
    se = jnp.exp(xs[0] - m)
    for k in range(1, c):
        se = se + jnp.exp(xs[k] - m)
    lse = m + jnp.log(se)

    tgt = xs[c - 1]                                            # gather by selects
    for k in range(c - 2, -1, -1):
        tgt = jnp.where(t == k, xs[k], tgt)
    ce = lse - tgt                                             # (R, 128)

    # Focal modulation.
    pt = jnp.exp(-ce)
    omp = jnp.maximum(1.0 - pt, 0.0)                           # guard fp negatives
    if gamma == 1.5:
        mod = omp * jnp.sqrt(omp)                              # x^1.5 = x*sqrt(x): 1 EUP op
    elif gamma == 2.0:
        mod = omp * omp
    elif gamma == 1.0:
        mod = omp
    elif gamma == 0.0:
        mod = jnp.ones_like(omp)
    else:
        mod = jnp.power(omp, jnp.float32(gamma))
    focal = jnp.where(valid, jnp.float32(alpha) * mod * ce, 0.0)

    # Fold this tile into the (8, 128) accumulator with elementwise VPU adds
    # (the sublane-tile-aligned reshape is a free relayout; no XLU reduce and
    #  no vreg->SMEM scalar round-trip in the steady-state loop).
    if r % 8 == 0:
        acc_ref[...] += jnp.sum(focal.reshape(r // 8, 8, lanes), axis=0)
    else:   # tiny single-step case (rows < 8): one cheap cross-sublane reduce
        acc_ref[0:1, :] = acc_ref[0:1, :] + jnp.sum(focal, axis=0, keepdims=True)

    # Final cross-lane reduce + scaling, once.
    @pl.when(i == pl.num_programs(0) - 1)
    def _():
        total = jnp.sum(acc_ref[...])
        if reduction == "mean":
            total = total * jnp.float32(inv_n)
        out_ref[0, 0] = total


def focal_loss(inputs, targets, *, alpha=1.0, gamma=1.5, reduction="mean",
               tile_rows=None):
    """Pallas TPU implementation of FocalLoss.forward (scalar reductions).

    inputs : (N, C) float logits, targets : (N,) int class ids.
    """
    assert inputs.ndim == 2, "expect (N, C) logits"
    assert targets.ndim == 1, "expect (N,) targets"
    assert reduction in ("mean", "sum"), reduction
    n, c = inputs.shape

    rows = pl.cdiv(n, _LANES)
    n_pad = rows * _LANES

    if tile_rows is None:
        tile_rows = _DEFAULT_TILE_ROWS
    if rows <= tile_rows:
        tile_rows = rows                          # single step, full-extent block
    else:
        tile_rows = max((tile_rows // 8) * 8, 8)  # keep (8,128) divisibility
    grid = (pl.cdiv(rows, tile_rows),)

    # Layout plumbing (one fused copy pass in XLA): (N, C) -> (C, rows, 128),
    # targets -> (rows, 128).  Only pad to the next multiple of 128 samples;
    # the ragged last *grid block* is handled in-kernel by the validity mask.
    # Keep the logits / targets dtypes -- the kernel casts in-register.
    x = jnp.pad(inputs.T, ((0, 0), (0, n_pad - n))).reshape(c, rows, _LANES)
    t = jnp.pad(targets, (0, n_pad - n)).reshape(rows, _LANES)

    kernel = functools.partial(
        _focal_loss_kernel,
        alpha=float(alpha), gamma=float(gamma),
        n_valid=n, tile_rows=tile_rows,
        inv_n=1.0 / float(n), reduction=reduction)

    cost = pl.CostEstimate(
        flops=(6 * c + 12) * n,
        transcendentals=(c + 3) * n,
        bytes_accessed=(n_pad * c * jnp.dtype(inputs.dtype).itemsize
                        + n_pad * jnp.dtype(targets.dtype).itemsize + 4),
    )

    out = pl.pallas_call(
        kernel,
        out_shape=jax.ShapeDtypeStruct((1, 1), jnp.float32),
        grid=grid,
        in_specs=[
            pl.BlockSpec((c, tile_rows, _LANES), lambda i: (0, i, 0)),  # logits
            pl.BlockSpec((tile_rows, _LANES), lambda i: (i, 0)),        # targets
        ],
        out_specs=pl.BlockSpec((1, 1), lambda i: (0, 0),
                               memory_space=pltpu.MemorySpace.SMEM),
        scratch_shapes=[pltpu.VMEM((8, _LANES), jnp.float32)],
        compiler_params=pltpu.CompilerParams(
            dimension_semantics=("arbitrary",),   # resident-accumulator axis
            vmem_limit_bytes=32 * 1024 * 1024,
        ),
        cost_estimate=cost,
    )(x, t)
    return out[0, 0]


def _focal_loss_ref(inputs, targets, alpha=1.0, gamma=1.5, reduction="mean"):
    """Pure-JAX reference mirroring the PyTorch module."""
    x = inputs.astype(jnp.float32)
    lse = jax.nn.logsumexp(x, axis=-1)
    tgt = jnp.take_along_axis(x, targets[:, None].astype(jnp.int32), axis=-1)[:, 0]
    ce = lse - tgt
    pt = jnp.exp(-ce)
    focal = alpha * (1.0 - pt) ** gamma * ce
    if reduction == "mean":
        return focal.mean()
    if reduction == "sum":
        return focal.sum()
    return focal


if __name__ == "__main__":
    key = jax.random.PRNGKey(0)
    k1, k2, k3, k4 = jax.random.split(key, 4)

    # Ternary classification: C = 3 classes, small batch N = 8.
    N, C = 8, 3
    logits = jax.random.normal(k1, (N, C), dtype=jnp.float32)
    targets = jax.random.randint(k2, (N,), 0, C, dtype=jnp.int32)

    loss = jax.block_until_ready(
        focal_loss(logits, targets, alpha=1.0, gamma=1.5, reduction="mean"))
    ref = _focal_loss_ref(logits, targets, alpha=1.0, gamma=1.5, reduction="mean")
    assert jnp.allclose(loss, ref, atol=1e-5, rtol=1e-5), (loss, ref)

    # Multi-tile grid + ragged last block + padding-mask path
    # (N=2500 -> rows=20, tile_rows=8 -> grid=3, last block ragged).
    N2 = 2500
    logits2 = jax.random.normal(k3, (N2, C), dtype=jnp.float32)
    targets2 = jax.random.randint(k4, (N2,), 0, C, dtype=jnp.int32)
    loss2 = jax.block_until_ready(
        focal_loss(logits2, targets2, alpha=1.0, gamma=1.5, reduction="mean",
                   tile_rows=8))
    ref2 = _focal_loss_ref(logits2, targets2, alpha=1.0, gamma=1.5,
                           reduction="mean")
    assert jnp.allclose(loss2, ref2, atol=1e-5, rtol=1e-5), (loss2, ref2)

    print("KERNEL_OK")
</pallas_src>

<mosaic_0001>
module attributes {stable_mosaic.version = 11 : i64} {
  func.func @_focal_loss_kernel(%arg0: i32, %arg1: memref<3x1x128xf32, #tpu.memory_space<vmem>>, %arg2: memref<1x128xi32, #tpu.memory_space<vmem>>, %arg3: memref<1x1xf32, #tpu.memory_space<smem>>, %arg4: memref<8x128xf32, #tpu.memory_space<vmem>>) attributes {dimension_semantics = [#tpu.dimension_semantics<arbitrary>], iteration_bounds = array<i64: 1>, scalar_prefetch = 0 : i64, scratch_operands = 1 : i64, tpu.core_type = #tpu.core_type<tc>, window_params = [{transform_indices = @transform_0, window_bounds = array<i64: 3, 1, 128>}, {transform_indices = @transform_1, window_bounds = array<i64: 1, 128>}, {transform_indices = @transform_2, window_bounds = array<i64: 1, 1>}]} {
    %c0_i32 = arith.constant 0 : i32
    %0 = arith.cmpi eq, %arg0, %c0_i32 : i32
    %1 = arith.extui %0 : i1 to i32
    %c0_i32_0 = arith.constant 0 : i32
    %2 = arith.cmpi ne, %1, %c0_i32_0 : i32
    scf.if %2 {
      %cst_25 = arith.constant 0.000000e+00 : f32
      %67 = vector.broadcast %cst_25 : f32 to vector<8x128xf32>
      %c0_26 = arith.constant 0 : index
      %c0_27 = arith.constant 0 : index
      %68 = vector.load %arg4[%c0_26, %c0_27] : memref<8x128xf32, #tpu.memory_space<vmem>>, vector<8x128xf32>
      tpu.vector_store %arg4[%c0_26, %c0_27], %67 {strides = array<i32>} : memref<8x128xf32, #tpu.memory_space<vmem>>, vector<8x128xf32>,
    } else {
    }
    %c0 = arith.constant 0 : index
    %c0_1 = arith.constant 0 : index
    %3 = vector.load %arg2[%c0, %c0_1] : memref<1x128xi32, #tpu.memory_space<vmem>>, vector<1x128xi32>
    %4 = tpu.iota {dimensions = array<i32: 0>} : vector<1x128xi32>
    %5 = tpu.iota {dimensions = array<i32: 1>} : vector<1x128xi32>
    %c1_i32 = arith.constant 1 : i32
    %6 = arith.muli %arg0, %c1_i32 : i32
    %7 = vector.broadcast %6 : i32 to vector<1x128xi32>
    %8 = arith.addi %7, %4 : vector<1x128xi32>
    %c128_i32 = arith.constant 128 : i32
    %9 = vector.broadcast %c128_i32 : i32 to vector<1x128xi32>
    %10 = arith.muli %8, %9 : vector<1x128xi32>
    %11 = arith.addi %10, %5 : vector<1x128xi32>
    %c8_i32 = arith.constant 8 : i32
    %12 = vector.broadcast %c8_i32 : i32 to vector<1x128xi32>
    %13 = arith.cmpi slt, %11, %12 : vector<1x128xi32>
    %c0_2 = arith.constant 0 : index
    %c0_3 = arith.constant 0 : index
    %c0_4 = arith.constant 0 : index
    %14 = vector.load %arg1[%c0_2, %c0_3, %c0_4] : memref<3x1x128xf32, #tpu.memory_space<vmem>>, vector<1x1x128xf32>
    %15 = vector.shape_cast %14 : vector<1x1x128xf32> to vector<1x128xf32>
    %cst = arith.constant 0.000000e+00 : f32
    %16 = vector.broadcast %cst : f32 to vector<1x128xf32>
    %17 = arith.select %13, %15, %16 : vector<1x128xi1>, vector<1x128xf32>
    %c1 = arith.constant 1 : index
    %c0_5 = arith.constant 0 : index
    %c0_6 = arith.constant 0 : index
    %18 = vector.load %arg1[%c1, %c0_5, %c0_6] : memref<3x1x128xf32, #tpu.memory_space<vmem>>, vector<1x1x128xf32>
    %19 = vector.shape_cast %18 : vector<1x1x128xf32> to vector<1x128xf32>
    %cst_7 = arith.constant 0.000000e+00 : f32
    %20 = vector.broadcast %cst_7 : f32 to vector<1x128xf32>
    %21 = arith.select %13, %19, %20 : vector<1x128xi1>, vector<1x128xf32>
    %c2 = arith.constant 2 : index
    %c0_8 = arith.constant 0 : index
    %c0_9 = arith.constant 0 : index
    %22 = vector.load %arg1[%c2, %c0_8, %c0_9] : memref<3x1x128xf32, #tpu.memory_space<vmem>>, vector<1x1x128xf32>
    %23 = vector.shape_cast %22 : vector<1x1x128xf32> to vector<1x128xf32>
    %cst_10 = arith.constant 0.000000e+00 : f32
    %24 = vector.broadcast %cst_10 : f32 to vector<1x128xf32>
    %25 = arith.select %13, %23, %24 : vector<1x128xi1>, vector<1x128xf32>
    %26 = arith.maximumf %17, %21 : vector<1x128xf32>
    %27 = arith.maximumf %26, %25 : vector<1x128xf32>
    %28 = arith.subf %17, %27 : vector<1x128xf32>
    %29 = math.exp %28 : vector<1x128xf32>
    %30 = arith.subf %21, %27 : vector<1x128xf32>
    %31 = math.exp %30 : vector<1x128xf32>
    %32 = arith.addf %29, %31 : vector<1x128xf32>
    %33 = arith.subf %25, %27 : vector<1x128xf32>
    %34 = math.exp %33 : vector<1x128xf32>
    %35 = arith.addf %32, %34 : vector<1x128xf32>
    %36 = math.log %35 : vector<1x128xf32>
    %37 = arith.addf %27, %36 : vector<1x128xf32>
    %c1_i32_11 = arith.constant 1 : i32
    %38 = vector.broadcast %c1_i32_11 : i32 to vector<1x128xi32>
    %39 = arith.cmpi eq, %3, %38 : vector<1x128xi32>
    %40 = arith.select %39, %21, %25 : vector<1x128xi1>, vector<1x128xf32>
    %c0_i32_12 = arith.constant 0 : i32
    %41 = vector.broadcast %c0_i32_12 : i32 to vector<1x128xi32>
    %42 = arith.cmpi eq, %3, %41 : vector<1x128xi32>
    %43 = arith.select %42, %17, %40 : vector<1x128xi1>, vector<1x128xf32>
    %44 = arith.subf %37, %43 : vector<1x128xf32>
    %cst_13 = arith.constant 0.000000e+00 : f32
    %45 = vector.broadcast %cst_13 : f32 to vector<1x128xf32>
    %46 = arith.subf %45, %44 : vector<1x128xf32>
    %47 = math.exp %46 : vector<1x128xf32>
    %cst_14 = arith.constant 1.000000e+00 : f32
    %48 = vector.broadcast %cst_14 : f32 to vector<1x128xf32>
    %49 = arith.subf %48, %47 : vector<1x128xf32>
    %cst_15 = arith.constant 0.000000e+00 : f32
    %50 = vector.broadcast %cst_15 : f32 to vector<1x128xf32>
    %51 = arith.maximumf %49, %50 : vector<1x128xf32>
    %52 = math.sqrt %51 : vector<1x128xf32>
    %53 = arith.mulf %51, %52 : vector<1x128xf32>
    %cst_16 = arith.constant 1.000000e+00 : f32
    %54 = vector.broadcast %cst_16 : f32 to vector<1x128xf32>
    %55 = arith.mulf %54, %53 : vector<1x128xf32>
    %56 = arith.mulf %55, %44 : vector<1x128xf32>
    %cst_17 = arith.constant 0.000000e+00 : f32
    %57 = vector.broadcast %cst_17 : f32 to vector<1x128xf32>
    %58 = arith.select %13, %56, %57 : vector<1x128xi1>, vector<1x128xf32>
    %c0_18 = arith.constant 0 : index
    %c0_19 = arith.constant 0 : index
    %59 = vector.load %arg4[%c0_18, %c0_19] : memref<8x128xf32, #tpu.memory_space<vmem>>, vector<1x128xf32>
    %cst_20 = arith.constant dense<0.000000e+00> : vector<128xf32>
    %60 = vector.multi_reduction <add>, %58, %cst_20 [0] : vector<1x128xf32> to vector<128xf32>
    %61 = vector.shape_cast %60 : vector<128xf32> to vector<1x128xf32>
    %62 = arith.addf %59, %61 : vector<1x128xf32>
    %c0_21 = arith.constant 0 : index
    %c0_22 = arith.constant 0 : index
    %63 = vector.load %arg4[%c0_21, %c0_22] : memref<8x128xf32, #tpu.memory_space<vmem>>, vector<1x128xf32>
    tpu.vector_store %arg4[%c0_21, %c0_22], %62 {strides = array<i32>} : memref<8x128xf32, #tpu.memory_space<vmem>>, vector<1x128xf32>,
    %c0_i32_23 = arith.constant 0 : i32
    %64 = arith.cmpi eq, %arg0, %c0_i32_23 : i32
    %65 = arith.extui %64 : i1 to i32
    %c0_i32_24 = arith.constant 0 : i32
    %66 = arith.cmpi ne, %65, %c0_i32_24 : i32
    scf.if %66 {
      %c0_25 = arith.constant 0 : index
      %c0_26 = arith.constant 0 : index
      %67 = vector.load %arg4[%c0_25, %c0_26] : memref<8x128xf32, #tpu.memory_space<vmem>>, vector<8x128xf32>
      %68 = vector.shape_cast %67 : vector<8x128xf32> to vector<1x8x128xf32>
      %cst_27 = arith.constant dense<0.000000e+00> : vector<1xf32>
      %69 = vector.multi_reduction <add>, %68, %cst_27 [1, 2] : vector<1x8x128xf32> to vector<1xf32>
      %70 = vector.shape_cast %69 : vector<1xf32> to vector<1x1x1xf32>
      %71 = vector.extract %70[0, 0, 0] : f32 from vector<1x1x1xf32>
      %cst_28 = arith.constant 1.250000e-01 : f32
      %72 = arith.mulf %71, %cst_28 : f32
      %c0_29 = arith.constant 0 : index
      %c0_30 = arith.constant 0 : index
      %73 = memref.load %arg3[%c0_29, %c0_30] : memref<1x1xf32, #tpu.memory_space<smem>>
      memref.store %72, %arg3[%c0_29, %c0_30] : memref<1x1xf32, #tpu.memory_space<smem>>
    } else {
    }
    return
  }
  func.func @transform_0(%arg0: i32) -> (i32, i32, i32) {
    %c0_i32 = arith.constant 0 : i32
    %c0_i32_0 = arith.constant 0 : i32
    %c0_i32_1 = arith.constant 0 : i32
    return %c0_i32, %arg0, %c0_i32_0 : i32, i32, i32
  }
  func.func @transform_1(%arg0: i32) -> (i32, i32) {
    %c0_i32 = arith.constant 0 : i32
    %c0_i32_0 = arith.constant 0 : i32
    return %arg0, %c0_i32 : i32, i32
  }
  func.func @transform_2(%arg0: i32) -> (i32, i32) {
    %c0_i32 = arith.constant 0 : i32
    %c0_i32_0 = arith.constant 0 : i32
    %c0_i32_1 = arith.constant 0 : i32
    return %c0_i32, %c0_i32_0 : i32, i32
  }
}

</mosaic_0001>

<bundles_post_ra>
// kernel: tpu_custom_call.1
= control target key start
LH: loop header
LB: loop body
LE: loop exit
PB: predicated region body
PF: predicated region fallthrough
CT: control target
= control target key end

     0   :  { %7 = vsyncpa [#allocation4], 0  ;;  %s203_s0 = inlined_call_operand.hbm [shape: f32[3,1,128], index: 0, kind: input, shape index: {}]   ;;  %s204_s1 = inlined_call_operand.vmem [shape: s32[1,128], index: 1, kind: input, shape index: {}]   ;;  %s205_s2 = inlined_call_operand.hbm [shape: f32[1,1], index: 2, kind: output, shape index: {}]  }
   0x1   :  { %8 = vsyncpa [#allocation5], 0  ;;  %s170_s9 = smov [#allocation3]  }
   0x2   :  { %s14_s10 = sshll.u32 %s170_s9, 4  ;;  %s15_s10 = int_to_ptr.vmem [resolvable:$true] %s14_s10 }
   0x3   :  { %s146_s11 = scalar_lea.vmem %s15_s10, 48  ;;  %s150_s12 = scalar_lea.vmem %s15_s10, 64 }
   0x4   :  { %p147_p0 = scmp.ne.s32.totalorder %s15_s10, %s146_s11  ;;  %p151_p1 = scmp.lt.s32.totalorder %s15_s10, %s15_s10 }
   0x5   :  { %p152_p2 = scmp.lt.s32.totalorder %s150_s12, %s146_s11 }
   0x7   :  { %p153_p3 = por %p152_p2, %p151_p1 }
   0x9   :  { %p154_p4 = pnand %p153_p3, %p147_p0 }
   0xb   :  { %157 = shalt.err (!%p154_p4)
}
   0xc   :  { %s171_s13 = smov 16   ;;  %s172_s14 = smov 1  }
   0xd   :  { %20 = dma.hbm_to_vmem [thread:$0]  %s203_s0, 48, %s15_s10, [#allocation4], %s171_s13, %s171_s13, %s172_s14  }
   0xe   :  { %166 = dma.done.wait [#allocation4], 48  }
   0xf   :  { %167 = vsyncadd [#allocation4], 4294967248  ;;  %v32_v0 = vlaneseq  ;;  %v173_v1 = vmov 0.0   ;;  %v41_v6 = vld [vmem:[#allocation3] sm:$0x1]  ;;  %s174_s19 = smov [#allocation6]  }
  0x10   :  { %30 = vst [vmem:[#allocation2] sm:$0xff] %v173_v1  ;;  %v44_v7 = vld [vmem:[#allocation3 + $0x1] sm:$0x1]  ;;  %v47_v8 = vld [vmem:[#allocation3 + $0x2] sm:$0x1] }
  0x11   :  { %v33_v2 = vshrl.u32 %v32_v0, 7  ;;  %v35_v3 = vand.u32 127, %v32_v0  ;;  %v31_v25 = vld [vmem:[%s204_s1] sm:$0x1] }
  0x12   :  { %vm65_vm1 = vcmp.eq.s32.totalorder %v31_v25, 1  ;;  %vm67_vm2 = vcmp.eq.s32.totalorder %v31_v25, 0 }
  0x13   :  { %v38_v4 = vmul.u32 128, %v33_v2 }
  0x15   :  { %v39_v5 = vadd.s32 %v38_v4, %v35_v3 }
  0x17   :  { %vm40_vm0 = vcmp.lt.s32.totalorder %v39_v5, 8  ;;  %v85_v44 = vld [vmem:[#allocation2] sm:$0x1] }
  0x18   :  { %v42_v9 = vsel %vm40_vm0, %v41_v6, 0.0  ;;  %v45_v10 = vsel %vm40_vm0, %v44_v7, 0.0  ;;  %v48_v11 = vsel %vm40_vm0, %v47_v8, 0.0 }
  0x19   :  { %v49_v12 = vmax.f32 %v42_v9, %v45_v10  ;;  %v66_v26 = vsel %vm65_vm1, %v45_v10, %v48_v11 }
  0x1a   :  { %v68_v29 = vsel %vm67_vm2, %v42_v9, %v66_v26 }
  0x1b   :  { %v50_v13 = vmax.f32 %v49_v12, %v48_v11 }
  0x1d   :  { %v51_v14 = vsub.f32 %v42_v9, %v50_v13  ;;  %v54_v15 = vsub.f32 %v45_v10, %v50_v13  ;;  %v58_v16 = vsub.f32 %v48_v11, %v50_v13 }
  0x1f   :  { %v52_v17 = vmul.f32 1.442695, %v51_v14  ;;  %v55_v18 = vmul.f32 1.442695, %v54_v15  ;;  %v59_v19 = vmul.f32 1.442695, %v58_v16 }
  0x21   :  { %126 = vpow2.f32 %v52_v17 }
  0x22   :  { %128 = vpow2.f32 %v55_v18 }
  0x23   :  { %130 = vpow2.f32 %v59_v19 }
  0x2e   :  { %v127_v20 = vpop.eup %126 }
  0x2f   :  { %v129_v21 = vpop.eup %128 }
  0x30   :  { %v131_v22 = vpop.eup %130  ;;  %v57_v23 = vadd.f32 %v129_v21, %v127_v20 }
  0x32   :  { %v61_v24 = vadd.f32 %v131_v22, %v57_v23 }
  0x34   :  { %132 = vlog2.f32 %v61_v24 }
  0x41   :  { %v133_v27 = vpop.eup %132 }
  0x42   :  { %v63_v28 = vmul.f32 0.6931472, %v133_v27 }
  0x44   :  { %v64_v30 = vadd.f32 %v63_v28, %v50_v13 }
  0x46   :  { %v69_v31 = vsub.f32 %v64_v30, %v68_v29 }
  0x48   :  { %v70_v32 = vsub.f32 0.0, %v69_v31 }
  0x4a   :  { %v71_v33 = vmul.f32 1.442695, %v70_v32 }
  0x4c   :  { %134 = vpow2.f32 %v71_v33 }
  0x59   :  { %v135_v34 = vpop.eup %134 }
  0x5a   :  { %v73_v35 = vsub.f32 1.0, %v135_v34 }
  0x5c   :  { %v74_v36 = vmax.f32 %v73_v35, 0.0 }
  0x5e   :  { %136 = vrsqrt.f32 %v74_v36  ;;  %vm77_vm3 = vcmp.eq.f32.partialorder %v74_v36, inf  ;;  %v80_v38 = vand.u32 2147483648, %v74_v36  ;;  %vm79_vm4 = vcmp.eq.f32.partialorder %v74_v36, 0.0 }
  0x6b   :  { %v137_v37 = vpop.eup %136 }
  0x6c   :  { %v76_v39 = vmul.f32 %v137_v37, %v74_v36 }
  0x6e   :  { %v78_v40 = vsel %vm77_vm3, %v74_v36, %v76_v39 }
  0x6f   :  { %v81_v41 = vsel %vm79_vm4, %v80_v38, %v78_v40 }
  0x70   :  { %v82_v42 = vmul.f32 %v81_v41, %v74_v36 }
  0x72   :  { %v83_v43 = vmul.f32 %v82_v42, %v69_v31 }
  0x74   :  { %v84_v45 = vsel %vm40_vm0, %v83_v43, 0.0 }
  0x75   :  { %v87_v46 = vadd.f32 %v85_v44, %v84_v45 }
  0x77   :  { %88 = vst [vmem:[#allocation2] sm:$0x1] %v87_v46 }
  0x7e   :  { %v92_v47 = vld [vmem:[#allocation2] sm:$0xff] }
  0x7f   :  { %93 = vadd.xlane.f32.xlu0 %v92_v47 }
 0x108   :  { %v94_v48 = vpop.xlane.xlu0 %93 }
 0x109   :  { %v95_v49 = vrot.slane %v94_v48, 4 }
 0x10b   :  { %v96_v50 = vadd.f32 %v95_v49, %v94_v48 }
 0x10d   :  { %v97_v51 = vrot.slane %v96_v50, 2 }
 0x10f   :  { %v98_v52 = vadd.f32 %v97_v51, %v96_v50 }
 0x111   :  { %v99_v53 = vrot.slane %v98_v52, 1 }
 0x113   :  { %v100_v54 = vadd.f32 %v99_v53, %v98_v52 }
 0x115   :  { %119 = vpush %v100_v54 }
 0x146   :  { %s120_s1 = spop %119 }
 0x147   :  { %s102_s18 = smul.f32 0.125, %s120_s1 }
 0x149   :  { %104 = sst [smem:[#allocation6]] %s102_s18 }
 0x14a   :  { %112 = dma.smem_to_hbm %s174_s19, 16, %s205_s2, [#allocation5]  }
 0x14b   :  { %168 = dma.done.wait [#allocation5], 16  }
 0x14c   :  { %169 = vsyncadd [#allocation5], 4294967280 }
 0x14d   :  { %116 = sfence }
 0x14e   :  { %117 = vsyncpa [#allocation4], 1 }
 0x14f   :  { %118 = vsyncpa [#allocation5], 1 }

</bundles_post_ra>
